<compile_context>
chip_gen: v5e
topology: v5e:2x2
jax: 0.10.0
libtpu: 0.0.40
codegen_flags: <defaults>
</compile_context>

<pallas_src>
import functools

import numpy as np
import jax
import jax.numpy as jnp
from jax import lax
from jax.experimental import pallas as pl
from jax.experimental.pallas import tpu as pltpu

EPSILON = float(np.finfo(np.float32).eps)
LANE = 128
SUBLANE = 8


def _round_up(n, m):
    return ((n + m - 1) // m) * m


def _regnet_kernel(y_ref, x_ref, w1_ref, w2_ref, out_ref, *,
                   n_layers, comp, comp_p, l2, c_const):
    """Runs all n_layers RegLayer updates on one batch tile.

    y_ref  : (TB, comp_p)                    f32  (current h tile)
    x_ref  : (TB, feat_p)                    f32
    w1_ref : (n_layers, comp_p, comp_p)      f32  (fc1 weights, resident)
    w2_ref : (n_layers*comp_p, feat_p)       f32  (all fc2 weights stacked)
    out_ref: (TB, comp_p)                    f32  (aliases the h input buffer)
    """
    x = x_ref[...]
    y = y_ref[...]

    # Hoisted constants (the layer loop is unrolled; JAX does not CSE splats).
    l2c = jnp.float32(l2)
    if comp == comp_p:
        c_row = jnp.full((1, comp_p), c_const, dtype=jnp.float32)
    else:
        # +1 on padded lanes keeps their denominator nonzero even if l1+eps == 0,
        # so padded h stays exactly 0 and never contaminates real lanes.
        lane = lax.broadcasted_iota(jnp.int32, (1, comp_p), 1)
        c_row = jnp.where(lane < comp, c_const, c_const + 1.0).astype(jnp.float32)

    # All numerators at once: x is layer-independent, so one wide MXU matmul
    # (N = n_layers*comp_p) instead of n_layers small ones on the critical path.
    numer_all = lax.dot_general(
        x, w2_ref[...],
        dimension_numbers=(((1,), (1,)), ((), ())),
        preferred_element_type=jnp.float32,
    )  # (TB, n_layers*comp_p)

    # Layer loop fully unrolled: n_layers is a Python constant, so weight
    # indexing and numerator slicing are static.
    for l in range(n_layers):
        w1 = w1_ref[l]                                        # (comp_p, comp_p)
        numer = numer_all[:, l * comp_p:(l + 1) * comp_p]     # x @ W2_l^T

        # denominator = y @ W1^T + l2*y + (l1 + eps)   (l2*y kept as exact f32 FMA)
        denom = lax.dot_general(
            y, w1,
            dimension_numbers=(((1,), (1,)), ((), ())),
            preferred_element_type=jnp.float32,
        ) + l2c * y + c_row

        # Exact division (approx reciprocal previously compounded to ~7% error
        # through near-cancelling denominators across layers).
        y = (numer / denom) * y

    out_ref[...] = y.astype(out_ref.dtype)


@functools.partial(jax.jit,
                   static_argnames=("l1", "l2", "max_batch_tile", "vmem_limit_bytes"))
def regnet_forward(h, x, w1_stack, w2_stack, *, l1=0.0, l2=0.0,
                   max_batch_tile=1024, vmem_limit_bytes=32 * 1024 * 1024):
    """
    h        : (B, comp)                  float32
    x        : (B, features)              float32
    w1_stack : (n_layers, comp, comp)     float32  -- fc1 weights, one per layer
    w2_stack : (n_layers, comp, features) float32  -- fc2 weights, one per layer
    Returns (B, comp) float32, matching RegNet.forward(h, x).

    NOTE: l1/l2 are static, so each distinct value triggers a recompile
    (operational cost only, matches baking them as kernel constants).
    """
    n_layers, comp, _ = w1_stack.shape
    B = h.shape[0]
    features = x.shape[1]

    comp_p = _round_up(comp, LANE)
    feat_p = _round_up(features, LANE)

    # ---- VMEM budget -> batch tile size ------------------------------------
    # Per batch row resident in VMEM: double-buffered h/x/out tiles plus the
    # hoisted (TB, n_layers*comp_p) numerator block.  Weight stacks are resident
    # (constant index_map) and counted double-buffered to stay conservative.
    bytes_per_row = 4 * (2 * (comp_p + feat_p + comp_p) + n_layers * comp_p)
    weight_bytes = 4 * 2 * (n_layers * comp_p * comp_p + n_layers * comp_p * feat_p)
    budget = int(vmem_limit_bytes * 0.75)          # headroom for compiler temps
    # TODO(synk): stream W1/W2 per layer with a manual double buffer when the
    # stacked weights alone exceed the budget (large n_layers*comp on v7x 64MiB).
    avail = max(budget - weight_bytes, SUBLANE * bytes_per_row)
    tb_mem = max(SUBLANE, (avail // bytes_per_row) // SUBLANE * SUBLANE)
    # Aim for >= 2 grid steps so v7x's two TensorCores both get batch tiles and
    # h/x DMAs overlap compute; tiny batches degenerate to a single step.
    tb_split = max(SUBLANE, _round_up(pl.cdiv(B, 2), SUBLANE))
    TB = int(min(max_batch_tile, tb_mem, tb_split))
    B_p = _round_up(B, TB)

    # ---- Lane-dense zero padding (fused into this jitted program) -----------
    w1_p = jnp.pad(w1_stack.astype(jnp.float32),
                   ((0, 0), (0, comp_p - comp), (0, comp_p - comp)))
    w2_p = jnp.pad(w2_stack.astype(jnp.float32),
                   ((0, 0), (0, comp_p - comp), (0, feat_p - features)))
    # Stack all layers' fc2 along the output dim -> one wide in-kernel matmul.
    w2_all = w2_p.reshape(n_layers * comp_p, feat_p)

    h_p = jnp.pad(h.astype(jnp.float32), ((0, B_p - B), (0, comp_p - comp)))
    x_p = jnp.pad(x.astype(jnp.float32), ((0, B_p - B), (0, feat_p - features)))

    kernel = functools.partial(
        _regnet_kernel,
        n_layers=int(n_layers), comp=int(comp), comp_p=int(comp_p),
        l2=float(l2), c_const=float(l1) + EPSILON,
    )

    out_p = pl.pallas_call(
        kernel,
        out_shape=jax.ShapeDtypeStruct((B_p, comp_p), jnp.float32),
        grid=(B_p // TB,),
        in_specs=[
            pl.BlockSpec((TB, comp_p), lambda i: (i, 0)),                    # h tile
            pl.BlockSpec((TB, feat_p), lambda i: (i, 0)),                    # x tile
            pl.BlockSpec((n_layers, comp_p, comp_p), lambda i: (0, 0, 0)),   # W1 stack (resident)
            pl.BlockSpec((n_layers * comp_p, feat_p), lambda i: (0, 0)),     # W2 stack (resident)
        ],
        out_specs=pl.BlockSpec((TB, comp_p), lambda i: (i, 0)),
        input_output_aliases={0: 0},  # h tile buffer reused for the output
        compiler_params=pltpu.CompilerParams(
            dimension_semantics=("parallel",),   # batch tiles shard across TCs
            vmem_limit_bytes=vmem_limit_bytes,
        ),
    )(h_p, x_p, w1_p, w2_all)

    return out_p[:B, :comp]


def _regnet_reference(h, x, w1_stack, w2_stack, l1, l2):
    """Pure-JAX reference mirroring the PyTorch RegNet forward (f32 matmuls)."""
    n_layers = w1_stack.shape[0]
    hp = jax.lax.Precision.HIGHEST
    for l in range(n_layers):
        denom = jnp.dot(h, w1_stack[l].T, precision=hp) + l2 * h + l1 + EPSILON
        numer = jnp.dot(x, w2_stack[l].T, precision=hp)
        h = (numer / denom) * h
    return h


if __name__ == "__main__":
    # Small shapes consistent with the module: n_layers=3, comp=32, features=64, batch=8.
    n_layers, B, comp, features = 3, 8, 32, 64
    L1, L2 = 0.1, 0.2

    key = jax.random.PRNGKey(0)
    k_h, k_x, k_w1, k_w2 = jax.random.split(key, 4)

    # Non-negative weights/inputs (NMF-style multiplicative updates): keeps every
    # denominator a sum of positive terms (>= l1 + eps), so f32 rounding in the
    # matmuls is not amplified by near-cancelling denominators.
    w1_stack = jax.random.uniform(k_w1, (n_layers, comp, comp), jnp.float32, 0.0, 0.1)
    w2_stack = jax.random.uniform(k_w2, (n_layers, comp, features), jnp.float32, 0.0, 0.1)
    h = jax.random.uniform(k_h, (B, comp), jnp.float32, 0.1, 1.0)
    x = jax.random.uniform(k_x, (B, features), jnp.float32, 0.1, 1.0)

    out = regnet_forward(h, x, w1_stack, w2_stack, l1=L1, l2=L2)
    out = jax.block_until_ready(out)

    ref = _regnet_reference(h, x, w1_stack, w2_stack, L1, L2)
    np.testing.assert_allclose(np.asarray(out), np.asarray(ref), rtol=5e-4, atol=5e-5)

    print("KERNEL_OK")
</pallas_src>

<mosaic_0001>
module attributes {stable_mosaic.version = 11 : i64} {
  func.func @_regnet_kernel(%arg0: i32, %arg1: memref<8x128xf32, #tpu.memory_space<vmem>>, %arg2: memref<8x128xf32, #tpu.memory_space<vmem>>, %arg3: memref<3x128x128xf32, #tpu.memory_space<vmem>>, %arg4: memref<384x128xf32, #tpu.memory_space<vmem>>, %arg5: memref<8x128xf32, #tpu.memory_space<vmem>>) attributes {dimension_semantics = [#tpu.dimension_semantics<parallel>], iteration_bounds = array<i64: 1>, scalar_prefetch = 0 : i64, scratch_operands = 0 : i64, tpu.core_type = #tpu.core_type<tc>, window_params = [{transform_indices = @transform_0, window_bounds = array<i64: 8, 128>}, {transform_indices = @transform_1, window_bounds = array<i64: 8, 128>}, {pipeline_mode = #tpu.pipeline_mode<synchronous>, transform_indices = @transform_2, window_bounds = array<i64: 3, 128, 128>}, {pipeline_mode = #tpu.pipeline_mode<synchronous>, transform_indices = @transform_3, window_bounds = array<i64: 384, 128>}, {transform_indices = @transform_4, window_bounds = array<i64: 8, 128>}]} {
    %c0 = arith.constant 0 : index
    %c0_0 = arith.constant 0 : index
    %0 = vector.load %arg2[%c0, %c0_0] : memref<8x128xf32, #tpu.memory_space<vmem>>, vector<8x128xf32>
    %c0_1 = arith.constant 0 : index
    %c0_2 = arith.constant 0 : index
    %1 = vector.load %arg1[%c0_1, %c0_2] : memref<8x128xf32, #tpu.memory_space<vmem>>, vector<8x128xf32>
    %2 = tpu.iota {dimensions = array<i32: 1>} : vector<1x128xi32>
    %c32_i32 = arith.constant 32 : i32
    %3 = vector.broadcast %c32_i32 : i32 to vector<1x128xi32>
    %4 = arith.cmpi slt, %2, %3 : vector<1x128xi32>
    %cst = arith.constant 0.100000121 : f32
    %cst_3 = arith.constant 1.10000014 : f32
    %5 = vector.broadcast %cst : f32 to vector<1x128xf32>
    %6 = vector.broadcast %cst_3 : f32 to vector<1x128xf32>
    %7 = arith.select %4, %5, %6 : vector<1x128xi1>, vector<1x128xf32>
    %c0_4 = arith.constant 0 : index
    %c0_5 = arith.constant 0 : index
    %8 = vector.load %arg4[%c0_4, %c0_5] : memref<384x128xf32, #tpu.memory_space<vmem>>, vector<384x128xf32>
    %cst_6 = arith.constant dense<0.000000e+00> : vector<8x384xf32>
    %9 = tpu.matmul %0, %8, %cst_6 {dimension_numbers = #tpu.dot_dimension_numbers<[1], [1], [0], [0], [0, 0, 1, 0], [], []>} : vector<8x128xf32>, vector<384x128xf32>, vector<8x384xf32> -> vector<8x384xf32>
    %c0_7 = arith.constant 0 : index
    %c0_8 = arith.constant 0 : index
    %c0_9 = arith.constant 0 : index
    %10 = vector.load %arg3[%c0_7, %c0_8, %c0_9] : memref<3x128x128xf32, #tpu.memory_space<vmem>>, vector<1x128x128xf32>
    %11 = vector.shape_cast %10 : vector<1x128x128xf32> to vector<128x128xf32>
    %12 = vector.extract_strided_slice %9 {offsets = [0, 0], sizes = [8, 128], strides = [1, 1]} : vector<8x384xf32> to vector<8x128xf32>
    %cst_10 = arith.constant dense<0.000000e+00> : vector<8x128xf32>
    %13 = tpu.matmul %1, %11, %cst_10 {dimension_numbers = #tpu.dot_dimension_numbers<[1], [1], [0], [0], [0, 0, 1, 0], [], []>} : vector<8x128xf32>, vector<128x128xf32>, vector<8x128xf32> -> vector<8x128xf32>
    %cst_11 = arith.constant 2.000000e-01 : f32
    %14 = vector.broadcast %cst_11 : f32 to vector<8x128xf32>
    %15 = arith.mulf %14, %1 : vector<8x128xf32>
    %16 = arith.addf %13, %15 : vector<8x128xf32>
    %17 = vector.broadcast %7 : vector<1x128xf32> to vector<8x128xf32>
    %18 = arith.addf %16, %17 : vector<8x128xf32>
    %19 = arith.divf %12, %18 : vector<8x128xf32>
    %20 = arith.mulf %19, %1 : vector<8x128xf32>
    %c1 = arith.constant 1 : index
    %c0_12 = arith.constant 0 : index
    %c0_13 = arith.constant 0 : index
    %21 = vector.load %arg3[%c1, %c0_12, %c0_13] : memref<3x128x128xf32, #tpu.memory_space<vmem>>, vector<1x128x128xf32>
    %22 = vector.shape_cast %21 : vector<1x128x128xf32> to vector<128x128xf32>
    %23 = vector.extract_strided_slice %9 {offsets = [0, 128], sizes = [8, 128], strides = [1, 1]} : vector<8x384xf32> to vector<8x128xf32>
    %cst_14 = arith.constant dense<0.000000e+00> : vector<8x128xf32>
    %24 = tpu.matmul %20, %22, %cst_14 {dimension_numbers = #tpu.dot_dimension_numbers<[1], [1], [0], [0], [0, 0, 1, 0], [], []>} : vector<8x128xf32>, vector<128x128xf32>, vector<8x128xf32> -> vector<8x128xf32>
    %cst_15 = arith.constant 2.000000e-01 : f32
    %25 = vector.broadcast %cst_15 : f32 to vector<8x128xf32>
    %26 = arith.mulf %25, %20 : vector<8x128xf32>
    %27 = arith.addf %24, %26 : vector<8x128xf32>
    %28 = vector.broadcast %7 : vector<1x128xf32> to vector<8x128xf32>
    %29 = arith.addf %27, %28 : vector<8x128xf32>
    %30 = arith.divf %23, %29 : vector<8x128xf32>
    %31 = arith.mulf %30, %20 : vector<8x128xf32>
    %c2 = arith.constant 2 : index
    %c0_16 = arith.constant 0 : index
    %c0_17 = arith.constant 0 : index
    %32 = vector.load %arg3[%c2, %c0_16, %c0_17] : memref<3x128x128xf32, #tpu.memory_space<vmem>>, vector<1x128x128xf32>
    %33 = vector.shape_cast %32 : vector<1x128x128xf32> to vector<128x128xf32>
    %34 = vector.extract_strided_slice %9 {offsets = [0, 256], sizes = [8, 128], strides = [1, 1]} : vector<8x384xf32> to vector<8x128xf32>
    %cst_18 = arith.constant dense<0.000000e+00> : vector<8x128xf32>
    %35 = tpu.matmul %31, %33, %cst_18 {dimension_numbers = #tpu.dot_dimension_numbers<[1], [1], [0], [0], [0, 0, 1, 0], [], []>} : vector<8x128xf32>, vector<128x128xf32>, vector<8x128xf32> -> vector<8x128xf32>
    %cst_19 = arith.constant 2.000000e-01 : f32
    %36 = vector.broadcast %cst_19 : f32 to vector<8x128xf32>
    %37 = arith.mulf %36, %31 : vector<8x128xf32>
    %38 = arith.addf %35, %37 : vector<8x128xf32>
    %39 = vector.broadcast %7 : vector<1x128xf32> to vector<8x128xf32>
    %40 = arith.addf %38, %39 : vector<8x128xf32>
    %41 = arith.divf %34, %40 : vector<8x128xf32>
    %42 = arith.mulf %41, %31 : vector<8x128xf32>
    %c0_20 = arith.constant 0 : index
    %c0_21 = arith.constant 0 : index
    %43 = vector.load %arg5[%c0_20, %c0_21] : memref<8x128xf32, #tpu.memory_space<vmem>>, vector<8x128xf32>
    tpu.vector_store %arg5[%c0_20, %c0_21], %42 {strides = array<i32>} : memref<8x128xf32, #tpu.memory_space<vmem>>, vector<8x128xf32>,
    return
  }
  func.func @transform_0(%arg0: i32) -> (i32, i32) {
    %c0_i32 = arith.constant 0 : i32
    %c0_i32_0 = arith.constant 0 : i32
    return %arg0, %c0_i32 : i32, i32
  }
  func.func @transform_1(%arg0: i32) -> (i32, i32) {
    %c0_i32 = arith.constant 0 : i32
    %c0_i32_0 = arith.constant 0 : i32
    return %arg0, %c0_i32 : i32, i32
  }
  func.func @transform_2(%arg0: i32) -> (i32, i32, i32) {
    %c0_i32 = arith.constant 0 : i32
    %c0_i32_0 = arith.constant 0 : i32
    %c0_i32_1 = arith.constant 0 : i32
    %c0_i32_2 = arith.constant 0 : i32
    return %c0_i32, %c0_i32_0, %c0_i32_1 : i32, i32, i32
  }
  func.func @transform_3(%arg0: i32) -> (i32, i32) {
    %c0_i32 = arith.constant 0 : i32
    %c0_i32_0 = arith.constant 0 : i32
    %c0_i32_1 = arith.constant 0 : i32
    return %c0_i32, %c0_i32_0 : i32, i32
  }
  func.func @transform_4(%arg0: i32) -> (i32, i32) {
    %c0_i32 = arith.constant 0 : i32
    %c0_i32_0 = arith.constant 0 : i32
    return %arg0, %c0_i32 : i32, i32
  }
}

</mosaic_0001>

<bundles_post_ra>
// kernel: regnet_forward.1
= control target key start
LH: loop header
LB: loop body
LE: loop exit
PB: predicated region body
PF: predicated region fallthrough
CT: control target
= control target key end

     0   :  { %v19_v59 = vlaneseq  ;;  %s682_s2 = inlined_call_operand.vmem [shape: f32[3,128,128], index: 2, kind: input, shape index: {}]   ;;  %s683_s3 = inlined_call_operand.vmem [shape: f32[384,128], index: 3, kind: input, shape index: {}]   ;;  %s684_s0 = inlined_call_operand.vmem [shape: f32[8,128], index: 0, kind: input, shape index: {}, may-alias: {0,4}]   ;;  %s685_s1 = inlined_call_operand.vmem [shape: f32[8,128], index: 1, kind: input, shape index: {}]   ;;  %s686_s4 = inlined_call_operand.vmem [shape: f32[8,128], index: 4, kind: output, shape index: {}, may-alias: {0,4}]  }
   0x1   :  { %v146_v0 = vld [vmem:[%s682_s2 + $0x78] sm:$0xff]  ;;  %v145_v1 = vld [vmem:[%s682_s2 + $0x70] sm:$0xff]  ;;  %v144_v4 = vld [vmem:[%s682_s2 + $0x68] sm:$0xff] }
   0x2   :  { %148 = vmatpush.xpose.msra.mxu3 %v146_v0  ;;  %v38_v2 = vld [vmem:[%s683_s3 + $0x78] sm:$0xff]  ;;  %v37_v3 = vld [vmem:[%s683_s3 + $0x70] sm:$0xff]  ;;  %v36_v5 = vld [vmem:[%s683_s3 + $0x68] sm:$0xff]  ;;  %v20_v62 = vand.u32 127, %v19_v59 }
   0x3   :  { %71 = vmatpush.xpose.msra.mxu0 %v38_v2  ;;  %v143_v6 = vld [vmem:[%s682_s2 + $0x60] sm:$0xff]  ;;  %v142_v8 = vld [vmem:[%s682_s2 + $0x58] sm:$0xff]  ;;  %v141_v10 = vld [vmem:[%s682_s2 + $0x50] sm:$0xff] }
   0x4   :  { %v35_v7 = vld [vmem:[%s683_s3 + $0x60] sm:$0xff]  ;;  %v34_v9 = vld [vmem:[%s683_s3 + $0x58] sm:$0xff]  ;;  %v33_v11 = vld [vmem:[%s683_s3 + $0x50] sm:$0xff]  ;;  %vm21_vm0 = vcmp.lt.s32.totalorder %v20_v62, 32 }
   0x5   :  { %v140_v12 = vld [vmem:[%s682_s2 + $0x48] sm:$0xff]  ;;  %v139_v14 = vld [vmem:[%s682_s2 + $0x40] sm:$0xff]  ;;  %v138_v16 = vld [vmem:[%s682_s2 + $0x38] sm:$0xff] }
   0x6   :  { %149 = vmatpush.xpose.msra.mxu3 %v145_v1  ;;  %v32_v13 = vld [vmem:[%s683_s3 + $0x48] sm:$0xff]  ;;  %v31_v15 = vld [vmem:[%s683_s3 + $0x40] sm:$0xff]  ;;  %v30_v17 = vld [vmem:[%s683_s3 + $0x38] sm:$0xff] }
   0x7   :  { %72 = vmatpush.xpose.msra.mxu0 %v37_v3  ;;  %v137_v18 = vld [vmem:[%s682_s2 + $0x30] sm:$0xff]  ;;  %v136_v20 = vld [vmem:[%s682_s2 + $0x28] sm:$0xff]  ;;  %v135_v22 = vld [vmem:[%s682_s2 + $0x20] sm:$0xff] }
   0x8   :  { %v29_v19 = vld [vmem:[%s683_s3 + $0x30] sm:$0xff]  ;;  %v28_v21 = vld [vmem:[%s683_s3 + $0x28] sm:$0xff]  ;;  %v27_v23 = vld [vmem:[%s683_s3 + $0x20] sm:$0xff] }
   0x9   :  { %v134_v24 = vld [vmem:[%s682_s2 + $0x18] sm:$0xff]  ;;  %v133_v26 = vld [vmem:[%s682_s2 + $0x10] sm:$0xff]  ;;  %v132_v29 = vld [vmem:[%s682_s2 + $0x8] sm:$0xff] }
   0xa   :  { %150 = vmatpush.xpose.msra.mxu3 %v144_v4  ;;  %v26_v25 = vld [vmem:[%s683_s3 + $0x18] sm:$0xff]  ;;  %v25_v27 = vld [vmem:[%s683_s3 + $0x10] sm:$0xff]  ;;  %v24_v30 = vld [vmem:[%s683_s3 + $0x8] sm:$0xff]  ;;  %v339_v4 = vmov 1.1000001  }
   0xb   :  { %73 = vmatpush.xpose.msra.mxu0 %v36_v5  ;;  %v54_v28 = vld [vmem:[%s683_s3 + $0xf8] sm:$0xff]  ;;  %v53_v31 = vld [vmem:[%s683_s3 + $0xf0] sm:$0xff]  ;;  %v131_v32 = vld [vmem:[%s682_s2] sm:$0xff]  ;;  %v567_v5 = vsel %vm21_vm0, 0.10000012, %v339_v4 }
   0xc   :  { %91 = vmatpush.xpose.msra.mxu1 %v54_v28  ;;  %v23_v33 = vld [vmem:[%s683_s3] sm:$0xff]  ;;  %v52_v34 = vld [vmem:[%s683_s3 + $0xe8] sm:$0xff]  ;;  %v315_v36 = vld [vmem:[%s682_s2 + $0xf8] sm:$0xff] }
   0xd   :  { %v473_v35 = vld [vmem:[%s684_s0] sm:$0xff]  ;;  %v314_v39 = vld [vmem:[%s682_s2 + $0xf0] sm:$0xff]  ;;  %v50_v40 = vld [vmem:[%s683_s3 + $0xd8] sm:$0xff] }
   0xe   :  { %151 = vmatpush.xpose.msra.mxu3 %v143_v6  ;;  %v481_v37 = vld [vmem:[%s685_s1] sm:$0xff]  ;;  %v313_v41 = vld [vmem:[%s682_s2 + $0xe8] sm:$0xff]  ;;  %v311_v43 = vld [vmem:[%s682_s2 + $0xd8] sm:$0xff]  ;;  %v147_v0 = vmul.f32 0.2, %v473_v35 }
   0xf   :  { %74 = vmatpush.xpose.msra.mxu0 %v35_v7  ;;  %v51_v38 = vld [vmem:[%s683_s3 + $0xe0] sm:$0xff]  ;;  %v310_v44 = vld [vmem:[%s682_s2 + $0xd0] sm:$0xff]  ;;  %v309_v45 = vld [vmem:[%s682_s2 + $0xc8] sm:$0xff] }
  0x10   :  { %92 = vmatpush.xpose.msra.mxu1 %v53_v31  ;;  %v312_v42 = vld [vmem:[%s682_s2 + $0xe0] sm:$0xff]  ;;  %v307_v47 = vld [vmem:[%s682_s2 + $0xb8] sm:$0xff]  ;;  %v306_v48 = vld [vmem:[%s682_s2 + $0xb0] sm:$0xff] }
  0x11   :  { %v308_v46 = vld [vmem:[%s682_s2 + $0xc0] sm:$0xff]  ;;  %v305_v49 = vld [vmem:[%s682_s2 + $0xa8] sm:$0xff]  ;;  %v49_v50 = vld [vmem:[%s683_s3 + $0xd0] sm:$0xff] }
  0x12   :  { %152 = vmatpush.xpose.msra.mxu3 %v142_v8  ;;  %v304_v51 = vld [vmem:[%s682_s2 + $0xa0] sm:$0xff]  ;;  %v48_v52 = vld [vmem:[%s683_s3 + $0xc8] sm:$0xff]  ;;  %v303_v53 = vld [vmem:[%s682_s2 + $0x98] sm:$0xff] }
  0x13   :  { %75 = vmatpush.xpose.msra.mxu0 %v34_v9  ;;  %v47_v54 = vld [vmem:[%s683_s3 + $0xc0] sm:$0xff]  ;;  %v302_v55 = vld [vmem:[%s682_s2 + $0x90] sm:$0xff]  ;;  %v46_v56 = vld [vmem:[%s683_s3 + $0xb8] sm:$0xff] }
  0x14   :  { %93 = vmatpush.xpose.msra.mxu1 %v52_v34  ;;  %v301_v57 = vld [vmem:[%s682_s2 + $0x88] sm:$0xff]  ;;  %v45_v58 = vld [vmem:[%s683_s3 + $0xb0] sm:$0xff]  ;;  %v300_v60 = vld [vmem:[%s682_s2 + $0x80] sm:$0xff] }
  0x15   :  { %v44_v61 = vld [vmem:[%s683_s3 + $0xa8] sm:$0xff]  ;;  %v43_v63 = vld [vmem:[%s683_s3 + $0xa0] sm:$0xff]  ;;  %v42_v1 = vld [vmem:[%s683_s3 + $0x98] sm:$0xff] }
  0x16   :  { %153 = vmatpush.xpose.msra.mxu3 %v141_v10  ;;  %v70_v2 = vld [vmem:[%s683_s3 + $0x178] sm:$0xff]  ;;  %v69_v3 = vld [vmem:[%s683_s3 + $0x170] sm:$0xff]  ;;  %v68_v10 = vld [vmem:[%s683_s3 + $0x168] sm:$0xff] }
  0x17   :  { %76 = vmatpush.xpose.msra.mxu0 %v33_v11  ;;  %111 = vmatpush.xpose.msra.mxu2 %v70_v2  ;;  %v41_v8 = vld [vmem:[%s683_s3 + $0x90] sm:$0xff]  ;;  %v40_v11 = vld [vmem:[%s683_s3 + $0x88] sm:$0xff]  ;;  %v328_v31 = vld [vmem:[%s682_s2 + $0x160] sm:$0xff] }
  0x18   :  { %94 = vmatpush.xpose.msra.mxu1 %v51_v38  ;;  %v326_v34 = vld [vmem:[%s682_s2 + $0x150] sm:$0xff]  ;;  %v323_v38 = vld [vmem:[%s682_s2 + $0x138] sm:$0xff]  ;;  %v55_v59 = vld [vmem:[%s683_s3 + $0x100] sm:$0xff] }
  0x1a   :  { %154 = vmatpush.xpose.msra.mxu3 %v140_v12  ;;  %v67_v12 = vld [vmem:[%s683_s3 + $0x160] sm:$0xff] }
  0x1b   :  { %77 = vmatpush.xpose.msra.mxu0 %v32_v13  ;;  %112 = vmatpush.xpose.msra.mxu2 %v69_v3  ;;  %v39_v13 = vld [vmem:[%s683_s3 + $0x80] sm:$0xff] }
  0x1c   :  { %95 = vmatpush.xpose.msra.mxu1 %v50_v40  ;;  %v64_v40 = vld [vmem:[%s683_s3 + $0x148] sm:$0xff] }
  0x1e   :  { %155 = vmatpush.xpose.msra.mxu3 %v139_v14  ;;  %v331_v14 = vld [vmem:[%s682_s2 + $0x178] sm:$0xff] }
  0x1f   :  { %78 = vmatpush.xpose.msra.mxu0 %v31_v15  ;;  %113 = vmatpush.xpose.msra.mxu2 %v68_v10 }
  0x20   :  { %96 = vmatpush.xpose.msra.mxu1 %v49_v50  ;;  %v59_v50 = vld [vmem:[%s683_s3 + $0x120] sm:$0xff] }
  0x22   :  { %156 = vmatpush.xpose.msra.mxu3 %v138_v16  ;;  %v66_v16 = vld [vmem:[%s683_s3 + $0x158] sm:$0xff] }
  0x23   :  { %79 = vmatpush.xpose.msra.mxu0 %v30_v17  ;;  %114 = vmatpush.xpose.msra.mxu2 %v67_v12 }
  0x24   :  { %97 = vmatpush.xpose.msra.mxu1 %v48_v52  ;;  %v58_v52 = vld [vmem:[%s683_s3 + $0x118] sm:$0xff] }
  0x26   :  { %157 = vmatpush.xpose.msra.mxu3 %v137_v18 }
  0x27   :  { %80 = vmatpush.xpose.msra.mxu0 %v29_v19  ;;  %v330_v19 = vld [vmem:[%s682_s2 + $0x170] sm:$0xff]  ;;  %115 = vmatpush.xpose.msra.mxu2 %v66_v16 }
  0x28   :  { %98 = vmatpush.xpose.msra.mxu1 %v47_v54 }
  0x2a   :  { %158 = vmatpush.xpose.msra.mxu3 %v136_v20 }
  0x2b   :  { %81 = vmatpush.xpose.msra.mxu0 %v28_v21  ;;  %v65_v21 = vld [vmem:[%s683_s3 + $0x150] sm:$0xff] }
  0x2c   :  { %99 = vmatpush.xpose.msra.mxu1 %v46_v56  ;;  %116 = vmatpush.xpose.msra.mxu2 %v65_v21 }
  0x2e   :  { %159 = vmatpush.xpose.msra.mxu3 %v135_v22 }
  0x2f   :  { %82 = vmatpush.xpose.msra.mxu0 %v27_v23 }
  0x30   :  { %100 = vmatpush.xpose.msra.mxu1 %v45_v58  ;;  %117 = vmatpush.xpose.msra.mxu2 %v64_v40 }
  0x32   :  { %160 = vmatpush.xpose.msra.mxu3 %v134_v24 }
  0x33   :  { %83 = vmatpush.xpose.msra.mxu0 %v26_v25  ;;  %v329_v25 = vld [vmem:[%s682_s2 + $0x168] sm:$0xff] }
  0x34   :  { %101 = vmatpush.xpose.msra.mxu1 %v44_v61 }
  0x36   :  { %161 = vmatpush.xpose.msra.mxu3 %v133_v26 }
  0x37   :  { %84 = vmatpush.xpose.msra.mxu0 %v25_v27 }
  0x38   :  { %102 = vmatpush.xpose.msra.mxu1 %v43_v63 }
  0x3a   :  { %162 = vmatpush.xpose.msra.mxu3 %v132_v29 }
  0x3b   :  { %85 = vmatpush.xpose.msra.mxu0 %v24_v30 }
  0x3c   :  { %103 = vmatpush.xpose.msra.mxu1 %v42_v1 }
  0x3e   :  { %163 = vmatpush.xpose.msra.mxu3 %v131_v32 }
  0x3f   :  { %86 = vmatpush.xpose.msra.mxu0 %v23_v33  ;;  %v327_v33 = vld [vmem:[%s682_s2 + $0x158] sm:$0xff] }
  0x40   :  { %104 = vmatpush.xpose.msra.mxu1 %v41_v8 }
  0x41   :  { %164 = vmatmul.f32.vlgmr.msra.gmra.mxu3 %v473_v35 }
  0x42   :  { %87 = vmatmul.f32.vlgmr.msra.gmra.mxu0 %v481_v37 }
  0x43   :  { %203 = vmatpush.xpose.msrb.mxu0 %v315_v36  ;;  %v325_v36 = vld [vmem:[%s682_s2 + $0x148] sm:$0xff] }
  0x44   :  { %105 = vmatpush.xpose.msra.mxu1 %v40_v11 }
  0x47   :  { %204 = vmatpush.xpose.msrb.mxu0 %v314_v39  ;;  %v322_v39 = vld [vmem:[%s682_s2 + $0x130] sm:$0xff] }
  0x48   :  { %106 = vmatpush.xpose.msra.mxu1 %v39_v13 }
  0x4b   :  { %205 = vmatpush.xpose.msrb.mxu0 %v313_v41  ;;  %107 = vmatmul.f32.vlgmr.msra.gmra.mxu1 %v481_v37  ;;  %v321_v41 = vld [vmem:[%s682_s2 + $0x128] sm:$0xff] }
  0x4c   :  { %258 = vmatpush.xpose.msrb.mxu1 %v331_v14 }
  0x4f   :  { %206 = vmatpush.xpose.msrb.mxu0 %v312_v42  ;;  %v63_v42 = vld [vmem:[%s683_s3 + $0x140] sm:$0xff] }
  0x50   :  { %259 = vmatpush.xpose.msrb.mxu1 %v330_v19  ;;  %118 = vmatpush.xpose.msra.mxu2 %v63_v42 }
  0x53   :  { %207 = vmatpush.xpose.msrb.mxu0 %v311_v43  ;;  %v320_v43 = vld [vmem:[%s682_s2 + $0x120] sm:$0xff] }
  0x54   :  { %260 = vmatpush.xpose.msrb.mxu1 %v329_v25 }
  0x57   :  { %208 = vmatpush.xpose.msrb.mxu0 %v310_v44  ;;  %v62_v44 = vld [vmem:[%s683_s3 + $0x138] sm:$0xff] }
  0x58   :  { %261 = vmatpush.xpose.msrb.mxu1 %v328_v31  ;;  %119 = vmatpush.xpose.msra.mxu2 %v62_v44 }
  0x5b   :  { %209 = vmatpush.xpose.msrb.mxu0 %v309_v45  ;;  %v319_v45 = vld [vmem:[%s682_s2 + $0x118] sm:$0xff] }
  0x5c   :  { %262 = vmatpush.xpose.msrb.mxu1 %v327_v33 }
  0x5f   :  { %210 = vmatpush.xpose.msrb.mxu0 %v308_v46  ;;  %v61_v46 = vld [vmem:[%s683_s3 + $0x130] sm:$0xff] }
  0x60   :  { %263 = vmatpush.xpose.msrb.mxu1 %v326_v34  ;;  %120 = vmatpush.xpose.msra.mxu2 %v61_v46 }
  0x63   :  { %211 = vmatpush.xpose.msrb.mxu0 %v307_v47  ;;  %v318_v47 = vld [vmem:[%s682_s2 + $0x110] sm:$0xff] }
  0x64   :  { %264 = vmatpush.xpose.msrb.mxu1 %v325_v36 }
  0x67   :  { %212 = vmatpush.xpose.msrb.mxu0 %v306_v48  ;;  %v60_v48 = vld [vmem:[%s683_s3 + $0x128] sm:$0xff] }
  0x68   :  { %121 = vmatpush.xpose.msra.mxu2 %v60_v48 }
  0x6b   :  { %213 = vmatpush.xpose.msrb.mxu0 %v305_v49  ;;  %v317_v49 = vld [vmem:[%s682_s2 + $0x108] sm:$0xff] }
  0x6c   :  { %122 = vmatpush.xpose.msra.mxu2 %v59_v50 }
  0x6f   :  { %214 = vmatpush.xpose.msrb.mxu0 %v304_v51  ;;  %v316_v51 = vld [vmem:[%s682_s2 + $0x100] sm:$0xff] }
  0x70   :  { %123 = vmatpush.xpose.msra.mxu2 %v58_v52 }
  0x73   :  { %215 = vmatpush.xpose.msrb.mxu0 %v303_v53  ;;  %v57_v53 = vld [vmem:[%s683_s3 + $0x110] sm:$0xff] }
  0x74   :  { %124 = vmatpush.xpose.msra.mxu2 %v57_v53 }
  0x77   :  { %216 = vmatpush.xpose.msrb.mxu0 %v302_v55  ;;  %v56_v55 = vld [vmem:[%s683_s3 + $0x108] sm:$0xff] }
  0x78   :  { %125 = vmatpush.xpose.msra.mxu2 %v56_v55 }
  0x7b   :  { %217 = vmatpush.xpose.msrb.mxu0 %v301_v57 }
  0x7c   :  { %126 = vmatpush.xpose.msra.mxu2 %v55_v59 }
  0x7f   :  { %218 = vmatpush.xpose.msrb.mxu0 %v300_v60  ;;  %127 = vmatmul.f32.vlgmr.msra.gmra.mxu2 %v481_v37 }
  0xbf   :  { %v88_v26 = vpop.f32.mrf.mxu0 }
  0xc4   :  { %v165_v6 = vpop.f32.mrf.mxu3 }
  0xc5   :  { %v166_v7 = vadd.f32 %v165_v6, %v147_v0 }
  0xc7   :  { %v168_v9 = vadd.f32 %v166_v7, %v567_v5 }
  0xc8   :  { %v108_v3 = vpop.f32.mrf.mxu1 }
  0xc9   :  { %333 = vrcp.f32 %v168_v9  ;;  %v180_v20 = vand.u32 2147483648, %v168_v9  ;;  %v178_v23 = vand.u32 2147483647, %v168_v9  ;;  %vm174_vm2 = vweird.f32 %v168_v9 }
  0xcb   :  { %v181_v27 = vor.u32 1.1754944e-38, %v180_v20  ;;  %vm179_vm4 = vcmp.eq.f32.partialorder %v178_v23, 8.507059e+37 }
  0xcf   :  { %v334_v15 = vpop.eup %333 }
  0xd0   :  { %v170_v17 = vmul.f32 %v334_v15, %v168_v9  ;;  %vm175_vm1 = vweird.f32 %v334_v15 }
  0xd1   :  { %vm176_vm3 = vmor %vm174_vm2, %vm175_vm1 }
  0xd2   :  { %v171_v18 = vsub.f32 1.0, %v170_v17 }
  0xd4   :  { %v172_v22 = vmul.f32 %v334_v15, %v171_v18 }
  0xd6   :  { %v173_v24 = vadd.f32 %v334_v15, %v172_v22 }
  0xd8   :  { %v177_v28 = vsel %vm176_vm3, %v334_v15, %v173_v24 }
  0xd9   :  { %v182_v29 = vsel %vm179_vm4, %v181_v27, %v177_v28 }
  0xda   :  { %v183_v30 = vmul.f32 %v182_v29, %v88_v26 }
  0xdc   :  { %v605_v32 = vmul.f32 %v183_v30, %v473_v35  ;;  %v324_v35 = vld [vmem:[%s682_s2 + $0x140] sm:$0xff] }
  0xdd   :  { %265 = vmatpush.xpose.msrb.mxu1 %v324_v35 }
  0xde   :  { %219 = vmatmul.f32.vlgmr.msrb.gmra.mxu0 %v605_v32  ;;  %v202_v54 = vmul.f32 0.2, %v605_v32 }
  0xe1   :  { %266 = vmatpush.xpose.msrb.mxu1 %v323_v38 }
  0xe5   :  { %267 = vmatpush.xpose.msrb.mxu1 %v322_v39 }
  0xe9   :  { %268 = vmatpush.xpose.msrb.mxu1 %v321_v41 }
  0xed   :  { %269 = vmatpush.xpose.msrb.mxu1 %v320_v43 }
  0xf1   :  { %270 = vmatpush.xpose.msrb.mxu1 %v319_v45 }
  0xf5   :  { %271 = vmatpush.xpose.msrb.mxu1 %v318_v47 }
  0xf9   :  { %272 = vmatpush.xpose.msrb.mxu1 %v317_v49 }
  0xfd   :  { %273 = vmatpush.xpose.msrb.mxu1 %v316_v51 }
 0x102   :  { %v128_v20 = vpop.f32.mrf.mxu2 }
 0x15b   :  { %v220_v56 = vpop.f32.mrf.mxu0 }
 0x15c   :  { %v221_v57 = vadd.f32 %v220_v56, %v202_v54 }
 0x15e   :  { %v223_v58 = vadd.f32 %v221_v57, %v567_v5 }
 0x160   :  { %335 = vrcp.f32 %v223_v58  ;;  %v235_v63 = vand.u32 2147483648, %v223_v58  ;;  %v233_v1 = vand.u32 2147483647, %v223_v58  ;;  %vm229_vm6 = vweird.f32 %v223_v58 }
 0x162   :  { %v236_v4 = vor.u32 1.1754944e-38, %v235_v63  ;;  %vm234_vm8 = vcmp.eq.f32.partialorder %v233_v1, 8.507059e+37 }
 0x166   :  { %v336_v60 = vpop.eup %335 }
 0x167   :  { %v225_v61 = vmul.f32 %v336_v60, %v223_v58  ;;  %vm230_vm5 = vweird.f32 %v336_v60 }
 0x168   :  { %vm231_vm7 = vmor %vm229_vm6, %vm230_vm5 }
 0x169   :  { %v226_v62 = vsub.f32 1.0, %v225_v61 }
 0x16b   :  { %v227_v0 = vmul.f32 %v336_v60, %v226_v62 }
 0x16d   :  { %v228_v2 = vadd.f32 %v336_v60, %v227_v0 }
 0x16f   :  { %v232_v6 = vsel %vm231_vm7, %v336_v60, %v228_v2 }
 0x170   :  { %v237_v7 = vsel %vm234_vm8, %v236_v4, %v232_v6 }
 0x171   :  { %v238_v8 = vmul.f32 %v237_v7, %v108_v3 }
 0x173   :  { %v239_v9 = vmul.f32 %v238_v8, %v605_v32 }
 0x175   :  { %274 = vmatmul.f32.vlgmr.msrb.gmra.mxu1 %v239_v9  ;;  %v257_v37 = vmul.f32 0.2, %v239_v9 }
 0x1f2   :  { %v275_v10 = vpop.f32.mrf.mxu1 }
 0x1f3   :  { %v276_v11 = vadd.f32 %v275_v10, %v257_v37 }
 0x1f5   :  { %v278_v12 = vadd.f32 %v276_v11, %v567_v5 }
 0x1f7   :  { %337 = vrcp.f32 %v278_v12  ;;  %v290_v16 = vand.u32 2147483648, %v278_v12  ;;  %v288_v18 = vand.u32 2147483647, %v278_v12  ;;  %vm284_vm10 = vweird.f32 %v278_v12 }
 0x1f9   :  { %v291_v21 = vor.u32 1.1754944e-38, %v290_v16  ;;  %vm289_vm12 = vcmp.eq.f32.partialorder %v288_v18, 8.507059e+37 }
 0x1fd   :  { %v338_v13 = vpop.eup %337 }
 0x1fe   :  { %v280_v14 = vmul.f32 %v338_v13, %v278_v12  ;;  %vm285_vm9 = vweird.f32 %v338_v13 }
 0x1ff   :  { %vm286_vm11 = vmor %vm284_vm10, %vm285_vm9 }
 0x200   :  { %v281_v15 = vsub.f32 1.0, %v280_v14 }
 0x202   :  { %v282_v17 = vmul.f32 %v338_v13, %v281_v15 }
 0x204   :  { %v283_v19 = vadd.f32 %v338_v13, %v282_v17 }
 0x206   :  { %v287_v22 = vsel %vm286_vm11, %v338_v13, %v283_v19 }
 0x207   :  { %v292_v23 = vsel %vm289_vm12, %v291_v21, %v287_v22 }
 0x208   :  { %v293_v24 = vmul.f32 %v292_v23, %v128_v20 }
 0x20a   :  { %v294_v25 = vmul.f32 %v293_v24, %v239_v9 }
 0x20c   :  { %295 = vst [vmem:[%s686_s4] sm:$0xff] %v294_v25 }

</bundles_post_ra>
